<compile_context>
chip_gen: v6e
topology: v6e:2x2x1
jax: 0.10.0
libtpu: 0.0.40
codegen_flags: <defaults>
</compile_context>

<pallas_src>
import jax
import jax.numpy as jnp
from jax.experimental import pallas as pl
from jax.experimental.pallas import tpu as pltpu

LANE = 128   # batch (lane) tiles are multiples of this
SUB = 8      # sublane granularity for the feature-major dims


def _round_up(n, m):
    return ((n + m - 1) // m) * m


# ---------------------------------------------------------------------------
# Kernel: one batch tile of the 3-layer MLP, feature-major.
# ---------------------------------------------------------------------------
def qnet_kernel(xt_ref, w1t_ref, b1t_ref, w2t_ref, b2t_ref, w3t_ref, b3t_ref,
                ot_ref):
    """
    xt_ref : [Sp=8, TB] f32   (state rows zero-padded to 8 sublanes)
    w1t_ref: [U,   Sp ] f32
    w2t_ref: [U,   U  ] f32
    w3t_ref: [Ap=8, U ] f32   (action rows zero-padded to 8 sublanes)
    b*t_ref: [*,   1  ] f32   (column biases, broadcast over lanes)
    ot_ref : [Ap=8, TB] f32   (lane-dense in batch -> unmasked stores)
    """
    hp = jax.lax.Precision.HIGHEST   # full-f32 MXU path; MXU is idle anyway

    # Layer 1: [U, Sp] @ [Sp, TB] -> [U, TB]
    h1 = jnp.dot(w1t_ref[...], xt_ref[...],
                 preferred_element_type=jnp.float32, precision=hp)
    h1 = jnp.maximum(h1 + b1t_ref[...], 0.0)

    # Layer 2: [U, U] @ [U, TB] -> [U, TB]
    h2 = jnp.dot(w2t_ref[...], h1,
                 preferred_element_type=jnp.float32, precision=hp)
    h2 = jnp.maximum(h2 + b2t_ref[...], 0.0)

    # Layer 3: [Ap, U] @ [U, TB] -> [Ap, TB]  (lane-dense Q-values)
    out = jnp.dot(w3t_ref[...], h2,
                  preferred_element_type=jnp.float32, precision=hp)
    ot_ref[...] = (out + b3t_ref[...]).astype(ot_ref.dtype)


# ---------------------------------------------------------------------------
# Parameter construction / packing
# ---------------------------------------------------------------------------
def init_params(key, state_size, action_size, units=64):
    """Mirrors the torch module: Kaiming-normal weights (fan_in, gain sqrt(2)),
    PyTorch-default uniform biases.  Weights stored as [in, out]."""
    ks = jax.random.split(key, 6)

    def kaiming(k, fan_in, fan_out):
        std = jnp.sqrt(2.0 / fan_in)
        return std * jax.random.normal(k, (fan_in, fan_out), dtype=jnp.float32)

    def bias(k, fan_in, fan_out):
        bound = 1.0 / jnp.sqrt(fan_in)
        return jax.random.uniform(k, (1, fan_out), dtype=jnp.float32,
                                  minval=-bound, maxval=bound)

    return {
        "w1": kaiming(ks[0], state_size, units),
        "b1": bias(ks[1], state_size, units),
        "w2": kaiming(ks[2], units, units),
        "b2": bias(ks[3], units, units),
        "w3": kaiming(ks[4], units, action_size),
        "b3": bias(ks[5], units, action_size),
    }


def pack_params(params):
    """Transpose to feature-major and zero-pad the tiny feature dims
    (state_size, action_size) to 8 sublanes.  Everything stays f32."""
    w1, b1 = params["w1"], params["b1"]
    w2, b2 = params["w2"], params["b2"]
    w3, b3 = params["w3"], params["b3"]
    S, U = w1.shape
    A = w3.shape[1]
    Sp = _round_up(S, SUB)
    Ap = _round_up(A, SUB)

    return {
        "w1t": jnp.pad(w1.T, ((0, 0), (0, Sp - S))).astype(jnp.float32),  # [U, Sp]
        "b1t": b1.T.astype(jnp.float32),                                  # [U, 1]
        "w2t": w2.T.astype(jnp.float32),                                  # [U, U]
        "b2t": b2.T.astype(jnp.float32),                                  # [U, 1]
        "w3t": jnp.pad(w3.T, ((0, Ap - A), (0, 0))).astype(jnp.float32),  # [Ap, U]
        "b3t": jnp.pad(b3.T, ((0, Ap - A), (0, 0))).astype(jnp.float32),  # [Ap, 1]
    }


# ---------------------------------------------------------------------------
# Forward wrapper
# ---------------------------------------------------------------------------
def qnet_forward(x, packed, *, action_size, tb=2048):
    """x: [B, state_size] f32  ->  Q-values [B, action_size] f32."""
    B, S = x.shape
    w1t, b1t = packed["w1t"], packed["b1t"]
    w2t, b2t = packed["w2t"], packed["b2t"]
    w3t, b3t = packed["w3t"], packed["b3t"]
    U, Sp = w1t.shape
    Ap = w3t.shape[0]

    # Batch tiling over lanes: TB is a multiple of 128.  Typical DQN batches
    # fit a single step; for big batches keep the step count even so v7x's two
    # TensorCores each get the same number of "parallel" grid iterations.
    B128 = _round_up(B, LANE)
    if B128 <= tb:
        steps, TB = 1, B128
    else:
        steps = pl.cdiv(B128, tb)
        steps += steps % 2
        TB = _round_up(pl.cdiv(B128, steps), LANE)
    Bp = steps * TB

    # Feature-major input: [Sp, Bp], zero-padded rows/columns.
    xt = jnp.pad(x.T, ((0, Sp - S), (0, Bp - B)))

    flops = 2 * Bp * (Sp * U + U * U + U * Ap)
    bytes_accessed = (xt.size + Ap * Bp
                      + w1t.size + w2t.size + w3t.size
                      + b1t.size + b2t.size + b3t.size) * 4

    out_t = pl.pallas_call(
        qnet_kernel,
        out_shape=jax.ShapeDtypeStruct((Ap, Bp), jnp.float32),
        grid=(steps,),
        in_specs=[
            pl.BlockSpec((Sp, TB), lambda i: (0, i)),   # x: tiled over batch lanes
            pl.BlockSpec((U, Sp), lambda i: (0, 0)),    # weights/biases resident
            pl.BlockSpec((U, 1), lambda i: (0, 0)),
            pl.BlockSpec((U, U), lambda i: (0, 0)),
            pl.BlockSpec((U, 1), lambda i: (0, 0)),
            pl.BlockSpec((Ap, U), lambda i: (0, 0)),
            pl.BlockSpec((Ap, 1), lambda i: (0, 0)),
        ],
        out_specs=pl.BlockSpec((Ap, TB), lambda i: (0, i)),
        compiler_params=pltpu.CompilerParams(
            dimension_semantics=("parallel",)),          # megacore split on v7x
        cost_estimate=pl.CostEstimate(flops=flops, transcendentals=0,
                                      bytes_accessed=bytes_accessed),
    )(xt, w1t, b1t, w2t, b2t, w3t, b3t)

    # Slice off padding and return batch-major Q-values (tiny transpose).
    return out_t[:action_size, :B].T


# ---------------------------------------------------------------------------
# Pure-JAX f32 reference (matches the fp32 PyTorch Q_net)
# ---------------------------------------------------------------------------
def qnet_forward_ref(x, p):
    hp = jax.lax.Precision.HIGHEST
    h1 = jnp.maximum(jnp.dot(x, p["w1"], precision=hp) + p["b1"], 0.0)
    h2 = jnp.maximum(jnp.dot(h1, p["w2"], precision=hp) + p["b2"], 0.0)
    return jnp.dot(h2, p["w3"], precision=hp) + p["b3"]


if __name__ == "__main__":
    # MountainCar: state_size=2, action_size=3.
    state_size, action_size, units, batch = 2, 3, 64, 8
    key = jax.random.PRNGKey(0)
    k_param, k_x = jax.random.split(key)

    params = init_params(k_param, state_size, action_size, units)
    packed = pack_params(params)

    # Small single-tile batch.
    x = jax.random.normal(k_x, (batch, state_size), dtype=jnp.float32)
    q = jax.block_until_ready(qnet_forward(x, packed, action_size=action_size))
    ref = qnet_forward_ref(x, params)
    assert q.shape == (batch, action_size)
    assert jnp.allclose(q, ref, atol=1e-3, rtol=1e-3)

    # Larger, non-multiple batch exercising the multi-step (even-count) grid.
    x_big = jax.random.normal(k_x, (1029, state_size), dtype=jnp.float32)
    q_big = jax.block_until_ready(
        qnet_forward(x_big, packed, action_size=action_size, tb=512))
    ref_big = qnet_forward_ref(x_big, params)
    assert q_big.shape == (1029, action_size)
    assert jnp.allclose(q_big, ref_big, atol=1e-3, rtol=1e-3)

    print("KERNEL_OK")
</pallas_src>

<mosaic_0001>
module attributes {stable_mosaic.version = 11 : i64} {
  func.func @qnet_kernel(%arg0: i32, %arg1: memref<8x128xf32, #tpu.memory_space<vmem>>, %arg2: memref<64x8xf32, #tpu.memory_space<vmem>>, %arg3: memref<64x1xf32, #tpu.memory_space<vmem>>, %arg4: memref<64x64xf32, #tpu.memory_space<vmem>>, %arg5: memref<64x1xf32, #tpu.memory_space<vmem>>, %arg6: memref<8x64xf32, #tpu.memory_space<vmem>>, %arg7: memref<8x1xf32, #tpu.memory_space<vmem>>, %arg8: memref<8x128xf32, #tpu.memory_space<vmem>>) attributes {dimension_semantics = [#tpu.dimension_semantics<parallel>], iteration_bounds = array<i64: 1>, scalar_prefetch = 0 : i64, scratch_operands = 0 : i64, tpu.core_type = #tpu.core_type<tc>, window_params = [{transform_indices = @transform_0, window_bounds = array<i64: 8, 128>}, {pipeline_mode = #tpu.pipeline_mode<synchronous>, transform_indices = @transform_1, window_bounds = array<i64: 64, 8>}, {pipeline_mode = #tpu.pipeline_mode<synchronous>, transform_indices = @transform_2, window_bounds = array<i64: 64, 1>}, {pipeline_mode = #tpu.pipeline_mode<synchronous>, transform_indices = @transform_3, window_bounds = array<i64: 64, 64>}, {pipeline_mode = #tpu.pipeline_mode<synchronous>, transform_indices = @transform_4, window_bounds = array<i64: 64, 1>}, {pipeline_mode = #tpu.pipeline_mode<synchronous>, transform_indices = @transform_5, window_bounds = array<i64: 8, 64>}, {pipeline_mode = #tpu.pipeline_mode<synchronous>, transform_indices = @transform_6, window_bounds = array<i64: 8, 1>}, {transform_indices = @transform_7, window_bounds = array<i64: 8, 128>}]} {
    %c0 = arith.constant 0 : index
    %c0_0 = arith.constant 0 : index
    %0 = vector.load %arg2[%c0, %c0_0] : memref<64x8xf32, #tpu.memory_space<vmem>>, vector<64x8xf32>
    %c0_1 = arith.constant 0 : index
    %c0_2 = arith.constant 0 : index
    %1 = vector.load %arg1[%c0_1, %c0_2] : memref<8x128xf32, #tpu.memory_space<vmem>>, vector<8x128xf32>
    %cst = arith.constant dense<0.000000e+00> : vector<64x128xf32>
    %2 = tpu.matmul %0, %1, %cst {dimension_numbers = #tpu.dot_dimension_numbers<[1], [0], [0], [1], [0, 0, 1, 1], [], []>, precision = #tpu.contract_precision<fp32>} : vector<64x8xf32>, vector<8x128xf32>, vector<64x128xf32> -> vector<64x128xf32>
    %c0_3 = arith.constant 0 : index
    %c0_4 = arith.constant 0 : index
    %3 = vector.load %arg3[%c0_3, %c0_4] : memref<64x1xf32, #tpu.memory_space<vmem>>, vector<64x1xf32>
    %4 = vector.broadcast %3 : vector<64x1xf32> to vector<64x128xf32>
    %5 = arith.addf %2, %4 : vector<64x128xf32>
    %cst_5 = arith.constant 0.000000e+00 : f32
    %6 = vector.broadcast %cst_5 : f32 to vector<64x128xf32>
    %7 = arith.maximumf %5, %6 : vector<64x128xf32>
    %c0_6 = arith.constant 0 : index
    %c0_7 = arith.constant 0 : index
    %8 = vector.load %arg4[%c0_6, %c0_7] : memref<64x64xf32, #tpu.memory_space<vmem>>, vector<64x64xf32>
    %cst_8 = arith.constant dense<0.000000e+00> : vector<64x128xf32>
    %9 = tpu.matmul %8, %7, %cst_8 {dimension_numbers = #tpu.dot_dimension_numbers<[1], [0], [0], [1], [0, 0, 1, 1], [], []>, precision = #tpu.contract_precision<fp32>} : vector<64x64xf32>, vector<64x128xf32>, vector<64x128xf32> -> vector<64x128xf32>
    %c0_9 = arith.constant 0 : index
    %c0_10 = arith.constant 0 : index
    %10 = vector.load %arg5[%c0_9, %c0_10] : memref<64x1xf32, #tpu.memory_space<vmem>>, vector<64x1xf32>
    %11 = vector.broadcast %10 : vector<64x1xf32> to vector<64x128xf32>
    %12 = arith.addf %9, %11 : vector<64x128xf32>
    %cst_11 = arith.constant 0.000000e+00 : f32
    %13 = vector.broadcast %cst_11 : f32 to vector<64x128xf32>
    %14 = arith.maximumf %12, %13 : vector<64x128xf32>
    %c0_12 = arith.constant 0 : index
    %c0_13 = arith.constant 0 : index
    %15 = vector.load %arg6[%c0_12, %c0_13] : memref<8x64xf32, #tpu.memory_space<vmem>>, vector<8x64xf32>
    %cst_14 = arith.constant dense<0.000000e+00> : vector<8x128xf32>
    %16 = tpu.matmul %15, %14, %cst_14 {dimension_numbers = #tpu.dot_dimension_numbers<[1], [0], [0], [1], [0, 0, 1, 1], [], []>, precision = #tpu.contract_precision<fp32>} : vector<8x64xf32>, vector<64x128xf32>, vector<8x128xf32> -> vector<8x128xf32>
    %c0_15 = arith.constant 0 : index
    %c0_16 = arith.constant 0 : index
    %17 = vector.load %arg7[%c0_15, %c0_16] : memref<8x1xf32, #tpu.memory_space<vmem>>, vector<8x1xf32>
    %18 = vector.broadcast %17 : vector<8x1xf32> to vector<8x128xf32>
    %19 = arith.addf %16, %18 : vector<8x128xf32>
    %c0_17 = arith.constant 0 : index
    %c0_18 = arith.constant 0 : index
    %20 = vector.load %arg8[%c0_17, %c0_18] : memref<8x128xf32, #tpu.memory_space<vmem>>, vector<8x128xf32>
    tpu.vector_store %arg8[%c0_17, %c0_18], %19 {strides = array<i32>} : memref<8x128xf32, #tpu.memory_space<vmem>>, vector<8x128xf32>,
    return
  }
  func.func @transform_0(%arg0: i32) -> (i32, i32) {
    %c0_i32 = arith.constant 0 : i32
    %c0_i32_0 = arith.constant 0 : i32
    return %c0_i32, %arg0 : i32, i32
  }
  func.func @transform_1(%arg0: i32) -> (i32, i32) {
    %c0_i32 = arith.constant 0 : i32
    %c0_i32_0 = arith.constant 0 : i32
    %c0_i32_1 = arith.constant 0 : i32
    return %c0_i32, %c0_i32_0 : i32, i32
  }
  func.func @transform_2(%arg0: i32) -> (i32, i32) {
    %c0_i32 = arith.constant 0 : i32
    %c0_i32_0 = arith.constant 0 : i32
    %c0_i32_1 = arith.constant 0 : i32
    return %c0_i32, %c0_i32_0 : i32, i32
  }
  func.func @transform_3(%arg0: i32) -> (i32, i32) {
    %c0_i32 = arith.constant 0 : i32
    %c0_i32_0 = arith.constant 0 : i32
    %c0_i32_1 = arith.constant 0 : i32
    return %c0_i32, %c0_i32_0 : i32, i32
  }
  func.func @transform_4(%arg0: i32) -> (i32, i32) {
    %c0_i32 = arith.constant 0 : i32
    %c0_i32_0 = arith.constant 0 : i32
    %c0_i32_1 = arith.constant 0 : i32
    return %c0_i32, %c0_i32_0 : i32, i32
  }
  func.func @transform_5(%arg0: i32) -> (i32, i32) {
    %c0_i32 = arith.constant 0 : i32
    %c0_i32_0 = arith.constant 0 : i32
    %c0_i32_1 = arith.constant 0 : i32
    return %c0_i32, %c0_i32_0 : i32, i32
  }
  func.func @transform_6(%arg0: i32) -> (i32, i32) {
    %c0_i32 = arith.constant 0 : i32
    %c0_i32_0 = arith.constant 0 : i32
    %c0_i32_1 = arith.constant 0 : i32
    return %c0_i32, %c0_i32_0 : i32, i32
  }
  func.func @transform_7(%arg0: i32) -> (i32, i32) {
    %c0_i32 = arith.constant 0 : i32
    %c0_i32_0 = arith.constant 0 : i32
    return %c0_i32, %arg0 : i32, i32
  }
}

</mosaic_0001>

<bundles_post_ra>
// kernel: tpu_custom_call.1
= control target key start
LH: loop header
LB: loop body
LE: loop exit
PB: predicated region body
PF: predicated region fallthrough
CT: control target
= control target key end

     0   :  { %vm84_vm0 = vcmask 64512   ;;  %v2951_v9 = vmov 0   ;;  %s3729_s0 = inlined_call_operand.vmem [shape: f32[8,128], index: 0, kind: input, shape index: {}]   ;;  %s3730_s1 = inlined_call_operand.vmem [shape: f32[64,8], index: 1, kind: input, shape index: {}]   ;;  %s3731_s2 = inlined_call_operand.vmem [shape: f32[64,1], index: 2, kind: input, shape index: {}]   ;;  %s3732_s3 = inlined_call_operand.vmem [shape: f32[64,64], index: 3, kind: input, shape index: {}]   ;;  %s3733_s4 = inlined_call_operand.vmem [shape: f32[64,1], index: 4, kind: input, shape index: {}]   ;;  %s3734_s5 = inlined_call_operand.vmem [shape: f32[8,64], index: 5, kind: input, shape index: {}]   ;;  %s3735_s6 = inlined_call_operand.vmem [shape: f32[8,1], index: 6, kind: input, shape index: {}]   ;;  %s3736_s7 = inlined_call_operand.hbm [shape: f32[8,128], index: 7, kind: output, shape index: {}]  }
   0x1   :  { %v35_v0 = vld [vmem:[%s3729_s0] sm:$0xff]  ;;  %v28_v2 = vld [vmem:[%s3730_s1 + $0x8] sm:$0xff]  ;;  %v29_v6 = vld [vmem:[%s3730_s1 + $0x10] sm:$0xff]  ;;  %2927 = vset.pattern.permute.xlu0 %v2951_v9  ;;  %2928 = vset.pattern.permute.xlu1 %v2951_v9 }
   0x2   :  { %v27_v1 = vld [vmem:[%s3730_s1] sm:$0xff]  ;;  %v3004_v3 = vand.u32 4294901760, %v35_v0  ;;  %v89_v5 = vsel %vm84_vm0, %v28_v2, 0  ;;  %v30_v7 = vld [vmem:[%s3730_s1 + $0x18] sm:$0xff]  ;;  %v92_v12 = vsel %vm84_vm0, %v29_v6, 0  ;;  %v32_v14 = vld [vmem:[%s3730_s1 + $0x28] sm:$0xff] }
   0x3   :  { %v86_v4 = vsel %vm84_vm0, %v27_v1, 0  ;;  %v31_v8 = vld [vmem:[%s3730_s1 + $0x20] sm:$0xff]  ;;  %v3019_v11 = vand.u32 4294901760, %v89_v5  ;;  %v95_v13 = vsel %vm84_vm0, %v30_v7, 0  ;;  %v3028_v16 = vand.u32 4294901760, %v92_v12  ;;  %v33_v19 = vld [vmem:[%s3730_s1 + $0x30] sm:$0xff] }
   0x4   :  { %v3017_v10 = vand.u32 4294901760, %v86_v4  ;;  %2557 = vmatprep.subr.mxu0 %v3004_v3  ;;  %v287_v15 = vsub.f32 %v35_v0, %v3004_v3  ;;  %v3030_v17 = vand.u32 4294901760, %v95_v13  ;;  %v98_v18 = vsel %vm84_vm0, %v31_v8, 0  ;;  %v43_v20 = vld [vmem:[%s3731_s2 + $0x38] sm:$0xff]  ;;  %v41_v21 = vld [vmem:[%s3731_s2 + $0x28] sm:$0xff]  ;;  %v42_v34 = vld [vmem:[%s3731_s2 + $0x30] sm:$0xff] }
   0x5   :  { %2558 = vmatpush3.msra.mxu0 %v3004_v3  ;;  %v3048_v23 = vsub.f32 %v89_v5, %v3019_v11  ;;  %v3050_v24 = vand.u32 4294901760, %v98_v18  ;;  %v101_v25 = vsel %vm84_vm0, %v32_v14, 0  ;;  %v3056_v27 = vsub.f32 %v92_v12, %v3028_v16  ;;  %81 = vperm.xlu0 %2927, %v43_v20   ;;  %v40_v39 = vld [vmem:[%s3731_s2 + $0x20] sm:$0xff]  ;;  %v34_v44 = vld [vmem:[%s3730_s1 + $0x38] sm:$0xff] }
   0x6   :  { %v3044_v22 = vsub.f32 %v86_v4, %v3017_v10  ;;  %2573 = vmatprep.mubr.f32.mxu1 %v3017_v10  ;;  %v3053_v26 = vand.u32 4294901760, %v287_v15  ;;  %2585 = vmatprep.subr.mxu0 %v287_v15  ;;  %v3059_v28 = vsub.f32 %v95_v13, %v3030_v17  ;;  %v3061_v29 = vand.u32 4294901760, %v101_v25 }
   0x7   :  { %v187_v31 = vand.u32 4294901760, %v3048_v23  ;;  %v3066_v32 = vsub.f32 %v98_v18, %v3050_v24  ;;  %v104_v33 = vsel %vm84_vm0, %v33_v19, 0  ;;  %71 = vperm.xlu1 %2928, %v41_v21   ;;  %v197_v36 = vand.u32 4294901760, %v3056_v27 }
   0x8   :  { %v177_v30 = vand.u32 4294901760, %v3044_v22  ;;  %v289_v35 = vsub.f32 %v287_v15, %v3053_v26  ;;  %v207_v37 = vand.u32 4294901760, %v3059_v28  ;;  %v3076_v38 = vsub.f32 %v101_v25, %v3061_v29 }
   0x9   :  { %v188_v41 = vsub.f32 %v3048_v23, %v187_v31  ;;  %v217_v42 = vand.u32 4294901760, %v3066_v32  ;;  %v3088_v43 = vand.u32 4294901760, %v104_v33  ;;  %v198_v46 = vsub.f32 %v3056_v27, %v197_v36  ;;  %76 = vperm.xlu0 %2927, %v42_v34  }
   0xa   :  { %v178_v40 = vsub.f32 %v3044_v22, %v177_v30  ;;  %v290_v45 = vand.u32 4294901760, %v289_v35  ;;  %v208_v47 = vsub.f32 %v3059_v28, %v207_v37  ;;  %v227_v48 = vand.u32 4294901760, %v3076_v38 }
   0xb   :  { %12 = vsyncpa [#allocation3], 0  ;;  %v189_v50 = vand.u32 4294901760, %v188_v41  ;;  %v218_v51 = vsub.f32 %v3066_v32, %v217_v42  ;;  %v3104_v52 = vsub.f32 %v104_v33, %v3088_v43  ;;  %66 = vperm.xlu1 %2928, %v40_v39   ;;  %v199_v53 = vand.u32 4294901760, %v198_v46  ;;  %v39_v63 = vld [vmem:[%s3731_s2 + $0x18] sm:$0xff]  ;;  %v38_v1 = vld [vmem:[%s3731_s2 + $0x10] sm:$0xff] }
   0xc   :  { %v179_v49 = vand.u32 4294901760, %v178_v40  ;;  %2571 = vmatprep.subr.mxu1 %v290_v45  ;;  %v107_v54 = vsel %vm84_vm0, %v34_v44, 0  ;;  %v209_v57 = vand.u32 4294901760, %v208_v47  ;;  %v228_v58 = vsub.f32 %v3076_v38, %v227_v48  ;;  %v37_v5 = vld [vmem:[%s3731_s2 + $0x8] sm:$0xff]  ;;  %v36_v7 = vld [vmem:[%s3731_s2] sm:$0xff]  ;;  %v879_v8 = vld [vmem:[%s3733_s4 + $0x38] sm:$0xff] }
   0xd   :  { %2572 = vmatpush3.msra.mxu1 %v290_v45  ;;  %v237_v55 = vand.u32 4294901760, %v3104_v52  ;;  %v3108_v56 = vand.u32 4294901760, %v107_v54  ;;  %v219_v59 = vand.u32 4294901760, %v218_v51  ;;  %61 = vperm.xlu0 %2927, %v39_v63   ;;  %v878_v9 = vld [vmem:[%s3733_s4 + $0x30] sm:$0xff]  ;;  %v877_v12 = vld [vmem:[%s3733_s4 + $0x28] sm:$0xff]  ;;  %v876_v13 = vld [vmem:[%s3733_s4 + $0x20] sm:$0xff] }
   0xe   :  { %2559 = vmatprep.mubr.f32.mxu0 %v179_v49  ;;  %2574 = vmatmul.mubr.f32.vlgmr.msra.gmra.mxu1 %v3019_v11  ;;  %v229_v0 = vand.u32 4294901760, %v228_v58  ;;  %v875_v14 = vld [vmem:[%s3733_s4 + $0x18] sm:$0xff]  ;;  %v872_v18 = vld [vmem:[%s3733_s4] sm:$0xff]  ;;  %vm920_vm1 = vcmask 523264   ;;  %vm2953_vm2 = vmmov 0  }
   0xf   :  { %2560 = vmatmul.mubr.f32.vlgmr.msra.gmra.mxu0 %v189_v50  ;;  %2599 = vmatprep.subr.mxu1 %v3004_v3  ;;  %v238_v60 = vsub.f32 %v3104_v52, %v237_v55  ;;  %v246_v61 = vsub.f32 %v107_v54, %v3108_v56  ;;  %v1792_v19 = vld [vmem:[%s3735_s6] sm:$0xff] }
  0x10   :  { %2586 = vmatpush3.msra.mxu0 %v287_v15  ;;  %2562 = vmatprep.mubr.f32.mxu0 %v199_v53  ;;  %v874_v15 = vld [vmem:[%s3733_s4 + $0x10] sm:$0xff] }
  0x11   :  { %2576 = vmatprep.mubr.f32.mxu1 %v3028_v16  ;;  %2600 = vmatpush3.msra.mxu1 %v3004_v3  ;;  %v247_v62 = vand.u32 4294901760, %v246_v61  ;;  %v239_v2 = vand.u32 4294901760, %v238_v60 }
  0x12   :  { %2613 = vmatprep.subr.mxu0 %v3053_v26  ;;  %2577 = vmatmul.mubr.f32.gmra.mxu1 %v3030_v17 }
  0x13   :  { %2563 = vmatmul.mubr.f32.gmra.mxu0 %v209_v57  ;;  %2579 = vmatprep.mubr.f32.mxu1 %v3050_v24  ;;  %v248_v4 = vsub.f32 %v246_v61, %v247_v62 }
  0x14   :  { %2565 = vmatprep.mubr.f32.mxu0 %v219_v59  ;;  %2627 = vmatprep.subr.mxu1 %v3004_v3 }
  0x15   :  { %56 = vperm.xlu1 %2928, %v38_v1   ;;  %v249_v6 = vand.u32 4294901760, %v248_v4  ;;  %51 = vperm.xlu0 %2927, %v37_v5  }
  0x16   :  { %2580 = vmatmul.mubr.f32.gmra.mxu1 %v3061_v29 }
  0x17   :  { %2566 = vmatmul.mubr.f32.gmra.mxu0 %v229_v0  ;;  %2582 = vmatprep.mubr.f32.mxu1 %v3088_v43 }
  0x18   :  { %2568 = vmatprep.mubr.f32.mxu0 %v239_v2 }
  0x19   :  { %46 = vperm.xlu1 %2928, %v36_v7   ;;  %917 = vperm.xlu0 %2927, %v879_v8  }
  0x1a   :  { %2583 = vmatmul.mubr.f32.gmra.mxu1 %v3108_v56 }
  0x1b   :  { %2569 = vmatmul.mubr.f32.gmra.mxu0 %v249_v6  ;;  %2601 = vmatprep.mubr.f32.mxu1 %v177_v30 }
  0x1c   :  { %2587 = vmatprep.mubr.f32.mxu0 %v3044_v22 }
  0x1d   :  { %912 = vperm.xlu1 %2928, %v878_v9   ;;  %907 = vperm.xlu0 %2927, %v877_v12  }
  0x1e   :  { %2602 = vmatmul.mubr.f32.vlgmr.msra.gmra.mxu1 %v187_v31 }
  0x1f   :  { %2588 = vmatmul.mubr.f32.vlgmr.msra.gmra.mxu0 %v3048_v23  ;;  %2604 = vmatprep.mubr.f32.mxu1 %v197_v36 }
  0x20   :  { %2614 = vmatpush3.msra.mxu0 %v3053_v26  ;;  %2590 = vmatprep.mubr.f32.mxu0 %v3056_v27 }
  0x21   :  { %2628 = vmatpush3.msra.mxu1 %v3004_v3  ;;  %902 = vperm.xlu1 %2928, %v876_v13   ;;  %v873_v3 = vld [vmem:[%s3733_s4 + $0x8] sm:$0xff] }
  0x22   :  { %2605 = vmatmul.mubr.f32.gmra.mxu1 %v207_v37  ;;  %897 = vperm.xlu0 %2927, %v875_v14  }
  0x23   :  { %2591 = vmatmul.mubr.f32.gmra.mxu0 %v3059_v28  ;;  %2607 = vmatprep.mubr.f32.mxu1 %v217_v42 }
  0x24   :  { %2593 = vmatprep.mubr.f32.mxu0 %v3066_v32 }
  0x25   :  { %892 = vperm.xlu1 %2928, %v874_v15  }
  0x26   :  { %2608 = vmatmul.mubr.f32.gmra.mxu1 %v227_v48  ;;  %887 = vperm.xlu0 %2927, %v873_v3  }
  0x27   :  { %2594 = vmatmul.mubr.f32.gmra.mxu0 %v3076_v38  ;;  %2610 = vmatprep.mubr.f32.mxu1 %v237_v55 }
  0x28   :  { %2596 = vmatprep.mubr.f32.mxu0 %v3104_v52 }
  0x29   :  { %882 = vperm.xlu1 %2928, %v872_v18  }
  0x2a   :  { %2611 = vmatmul.mubr.f32.gmra.mxu1 %v247_v62  ;;  %1795 = vperm.xlu0 %2927, %v1792_v19  }
  0x2b   :  { %2597 = vmatmul.mubr.f32.gmra.mxu0 %v246_v61  ;;  %2629 = vmatprep.mubr.f32.mxu1 %v3017_v10 }
  0x2c   :  { %2615 = vmatprep.mubr.f32.mxu0 %v3017_v10  ;;  %v864_v10 = vld [vmem:[%s3732_s3] sm:$0xff] }
  0x2e   :  { %2630 = vmatmul.mubr.f32.vlgmr.msra.gmra.mxu1 %v3019_v11 }
  0x2f   :  { %2616 = vmatmul.mubr.f32.vlgmr.msra.gmra.mxu0 %v3019_v11  ;;  %2632 = vmatprep.mubr.f32.mxu1 %v3028_v16  ;;  %v922_v11 = vsel %vm920_vm1, %v864_v10, 0 }
  0x30   :  { %2618 = vmatprep.mubr.f32.mxu0 %v3028_v16  ;;  %v3210_v16 = vand.u32 4294901760, %v922_v11 }
  0x32   :  { %2633 = vmatmul.mubr.f32.gmra.mxu1 %v3030_v17 }
  0x33   :  { %2619 = vmatmul.mubr.f32.gmra.mxu0 %v3030_v17  ;;  %2635 = vmatprep.mubr.f32.mxu1 %v3050_v24  ;;  %v3213_v17 = vsub.f32 %v922_v11, %v3210_v16 }
  0x34   :  { %2621 = vmatprep.mubr.f32.mxu0 %v3050_v24 }
  0x35   :  { %v1020_v20 = vand.u32 4294901760, %v3213_v17 }
  0x36   :  { %2636 = vmatmul.mubr.f32.gmra.mxu1 %v3061_v29 }
  0x37   :  { %2622 = vmatmul.mubr.f32.gmra.mxu0 %v3061_v29  ;;  %2638 = vmatprep.mubr.f32.mxu1 %v3088_v43  ;;  %v1021_v21 = vsub.f32 %v3213_v17, %v1020_v20 }
  0x38   :  { %2624 = vmatprep.mubr.f32.mxu0 %v3088_v43 }
  0x39   :  { %v1022_v22 = vand.u32 4294901760, %v1021_v21 }
  0x3a   :  { %2639 = vmatmul.mubr.f32.gmra.mxu1 %v3108_v56 }
  0x3b   :  { %2625 = vmatmul.mubr.f32.gmra.mxu0 %v3108_v56  ;;  %2685 = vmatprep.mubr.f32.mxu1 %v3210_v16 }
  0x3c   :  { %2657 = vmatprep.mubr.f32.mxu0 %v1022_v22 }
  0x80   :  { %v82_v35 = vpop.permute.xlu0 %81 }
  0x82   :  { %v72_v38 = vpop.permute.xlu1 %71 }
  0x84   :  { %v77_v43 = vpop.permute.xlu0 %76 }
  0x86   :  { %v67_v46 = vpop.permute.xlu1 %66 }
  0x88   :  { %v62_v51 = vpop.permute.xlu0 %61 }
  0x90   :  { %v57_v54 = vpop.permute.xlu1 %56  ;;  %v52_v60 = vpop.permute.xlu0 %51 }
  0x94   :  { %v47_v1 = vpop.permute.xlu1 %46 }
  0xce   :  { %v2575_v24 = vpop.f32.mrf.mxu1 }
  0xcf   :  { %v2561_v23 = vpop.f32.mrf.mxu0 }
  0xd0   :  { %v327_v26 = vpop.f32.mrf.mxu1  ;;  %v192_v5 = vadd.f32 %v2561_v23, %v52_v60 }
  0xd1   :  { %v181_v25 = vpop.f32.mrf.mxu0 }
  0xd2   :  { %v2578_v28 = vpop.f32.mrf.mxu1  ;;  %v182_v13 = vadd.f32 %v181_v25, %v47_v1  ;;  %v334_v11 = vadd.f32 %v2575_v24, %v192_v5 }
  0xd3   :  { %v2564_v27 = vpop.f32.mrf.mxu0 }
  0xd4   :  { %v339_v30 = vpop.f32.mrf.mxu1  ;;  %v212_v57 = vadd.f32 %v2564_v27, %v62_v51 }
  0xd5   :  { %v201_v29 = vpop.f32.mrf.mxu0 }
  0xd6   :  { %v2581_v32 = vpop.f32.mrf.mxu1  ;;  %v202_v61 = vadd.f32 %v201_v29, %v57_v54  ;;  %v346_v2 = vadd.f32 %v2578_v28, %v212_v57 }
  0xd7   :  { %v2567_v31 = vpop.f32.mrf.mxu0 }
  0xd8   :  { %v351_v34 = vpop.f32.mrf.mxu1  ;;  %v232_v62 = vadd.f32 %v2567_v31, %v72_v38  ;;  %v340_v8 = vadd.f32 %v339_v30, %v202_v61  ;;  %v328_v31 = vadd.f32 %v327_v26, %v182_v13 }
  0xd9   :  { %v221_v33 = vpop.f32.mrf.mxu0 }
  0xda   :  { %v2584_v37 = vpop.f32.mrf.mxu1  ;;  %v222_v4 = vadd.f32 %v221_v33, %v67_v46  ;;  %v358_v14 = vadd.f32 %v2581_v32, %v232_v62 }
  0xdb   :  { %v2570_v36 = vpop.f32.mrf.mxu0 }
  0xdc   :  { %v363_v40 = vpop.f32.mrf.mxu1  ;;  %v252_v9 = vadd.f32 %v2570_v36, %v82_v35  ;;  %v352_v18 = vadd.f32 %v351_v34, %v222_v4 }
  0xdd   :  { %v241_v39 = vpop.f32.mrf.mxu0 }
  0xde   :  { %v2603_v42 = vpop.f32.mrf.mxu1  ;;  %v242_v19 = vadd.f32 %v241_v39, %v77_v43  ;;  %v370_v28 = vadd.f32 %v2584_v37, %v252_v9  ;;  %v865_v37 = vld [vmem:[%s3732_s3 + $0x8] sm:$0xff] }
  0xdf   :  { %v2589_v41 = vpop.f32.mrf.mxu0 }
  0xe0   :  { %v3220_v45 = vpop.f32.mrf.mxu1  ;;  %v451_v33 = vadd.f32 %v2589_v41, %v334_v11  ;;  %v364_v36 = vadd.f32 %v363_v40, %v242_v19 }
  0xe1   :  { %v443_v44 = vpop.f32.mrf.mxu0 }
  0xe2   :  { %v2606_v48 = vpop.f32.mrf.mxu1  ;;  %v444_v46 = vadd.f32 %v443_v44, %v328_v31 }
  0xe3   :  { %v2592_v47 = vpop.f32.mrf.mxu0 }
  0xe4   :  { %v582_v50 = vpop.f32.mrf.mxu1  ;;  %v465_v12 = vadd.f32 %v2592_v47, %v346_v2  ;;  %v567_v54 = vadd.f32 %v3220_v45, %v444_v46 }
  0xe5   :  { %v457_v49 = vpop.f32.mrf.mxu0 }
  0xe6   :  { %v2609_v53 = vpop.f32.mrf.mxu1  ;;  %v458_v10 = vadd.f32 %v457_v49, %v340_v8  ;;  %v591_v29 = vadd.f32 %v2606_v48, %v465_v12  ;;  %v575_v48 = vadd.f32 %v2603_v42, %v451_v33  ;;  %v866_v42 = vld [vmem:[%s3732_s3 + $0x10] sm:$0xff] }
  0xe7   :  { %v2595_v52 = vpop.f32.mrf.mxu0  ;;  %v928_v13 = vsel %vm920_vm1, %v866_v42, 0 }
  0xe8   :  { %v598_v56 = vpop.f32.mrf.mxu1  ;;  %v479_v21 = vadd.f32 %v2595_v52, %v358_v14  ;;  %v583_v25 = vadd.f32 %v582_v50, %v458_v10  ;;  %v868_v10 = vld [vmem:[%s3732_s3 + $0x20] sm:$0xff]  ;;  %v3260_v33 = vand.u32 4294901760, %v928_v13 }
  0xe9   :  { %v471_v55 = vpop.f32.mrf.mxu0 }
  0xea   :  { %v2612_v59 = vpop.f32.mrf.mxu1  ;;  %v472_v23 = vadd.f32 %v471_v55, %v352_v18  ;;  %v607_v47 = vadd.f32 %v2609_v53, %v479_v21 }
  0xeb   :  { %v2598_v58 = vpop.f32.mrf.mxu0 }
  0xec   :  { %v614_v0 = vpop.f32.mrf.mxu1  ;;  %v493_v32 = vadd.f32 %v2598_v58, %v370_v28  ;;  %v599_v43 = vadd.f32 %v598_v56, %v472_v23  ;;  %v925_v56 = vsel %vm920_vm1, %v865_v37, 0  ;;  %v3296_v37 = vsub.f32 %v928_v13, %v3260_v33 }
  0xed   :  { %v485_v63 = vpop.f32.mrf.mxu0  ;;  %v3237_v12 = vand.u32 4294901760, %v925_v56 }
  0xee   :  { %v2631_v7 = vpop.f32.mrf.mxu1  ;;  %v486_v24 = vadd.f32 %v485_v63, %v364_v36  ;;  %v623_v52 = vadd.f32 %v2612_v59, %v493_v32 }
  0xef   :  { %v2617_v6 = vpop.f32.mrf.mxu0  ;;  %v3258_v31 = vsub.f32 %v925_v56, %v3237_v12 }
  0xf0   :  { %v3222_v3 = vpop.f32.mrf.mxu1  ;;  %v703_v44 = vadd.f32 %v2617_v6, %v575_v48  ;;  %v615_v58 = vadd.f32 %v614_v0, %v486_v24  ;;  %v867_v6 = vld [vmem:[%s3732_s3 + $0x18] sm:$0xff] }
  0xf1   :  { %v696_v15 = vpop.f32.mrf.mxu0 }
  0xf2   :  { %v2634_v27 = vpop.f32.mrf.mxu1  ;;  %v697_v63 = vadd.f32 %v696_v15, %v567_v54  ;;  %v817_v8 = vadd.f32 %v2631_v7, %v703_v44  ;;  %v931_v7 = vsel %vm920_vm1, %v867_v6, 0 }
  0xf3   :  { %v2620_v22 = vpop.f32.mrf.mxu0 }
  0xf4   :  { %v822_v35 = vpop.f32.mrf.mxu1  ;;  %v715_v38 = vadd.f32 %v2620_v22, %v591_v29  ;;  %v811_v11 = vadd.f32 %v3222_v3, %v697_v63  ;;  %v869_v29 = vld [vmem:[%s3732_s3 + $0x28] sm:$0xff]  ;;  %v857_v23 = vmax.f32 %v817_v8, 0.0  ;;  %v934_v3 = vsel %vm920_vm1, %v868_v10, 0 }
  0xf5   :  { %v708_v30 = vpop.f32.mrf.mxu0  ;;  %v937_v46 = vsel %vm920_vm1, %v869_v29, 0  ;;  %v3298_v48 = vand.u32 4294901760, %v934_v3 }
  0xf6   :  { %v2637_v39 = vpop.f32.mrf.mxu1  ;;  %v709_v49 = vadd.f32 %v708_v30, %v583_v25  ;;  %v829_v40 = vadd.f32 %v2634_v27, %v715_v38  ;;  %v856_v32 = vmax.f32 %v811_v11, 0.0  ;;  %v3275_v38 = vand.u32 4294901760, %v931_v7 }
  0xf7   :  { %v2623_v34 = vpop.f32.mrf.mxu0  ;;  %v3291_v24 = vand.u32 4294901760, %v857_v23  ;;  %v3321_v44 = vand.u32 4294901760, %v937_v46 }
  0xf8   :  { %v727_v26 = vadd.f32 %v2623_v34, %v607_v47  ;;  %v834_v51 = vpop.f32.mrf.mxu1  ;;  %v823_v60 = vadd.f32 %v822_v35, %v709_v49  ;;  %v859_v2 = vmax.f32 %v829_v40, 0.0  ;;  %v1030_v49 = vand.u32 4294901760, %v3258_v31  ;;  %v870_v40 = vld [vmem:[%s3732_s3 + $0x30] sm:$0xff] }
  0xf9   :  { %v720_v41 = vpop.f32.mrf.mxu0  ;;  %v3319_v54 = vsub.f32 %v931_v7, %v3275_v38  ;;  %v940_v42 = vsel %vm920_vm1, %v870_v40, 0 }
  0xfa   :  { %v721_v50 = vadd.f32 %v720_v41, %v599_v43  ;;  %v841_v53 = vadd.f32 %v2637_v39, %v727_v26  ;;  %v2640_v57 = vpop.f32.mrf.mxu1  ;;  %v858_v14 = vmax.f32 %v823_v60, 0.0  ;;  %v3247_v21 = vand.u32 4294901760, %v859_v2 }
  0xfb   :  { %v2626_v55 = vpop.f32.mrf.mxu0  ;;  %v3335_v60 = vsub.f32 %v857_v23, %v3291_v24  ;;  %v3364_v13 = vand.u32 4294901760, %v940_v42 }
  0xfc   :  { %v835_v61 = vadd.f32 %v834_v51, %v721_v50  ;;  %v739_v62 = vadd.f32 %v2626_v55, %v623_v52  ;;  %v861_v59 = vmax.f32 %v841_v53, 0.0  ;;  %v846_v9 = vpop.f32.mrf.mxu1  ;;  %v3263_v30 = vand.u32 4294901760, %v858_v14 }
  0xfd   :  { %v732_v1 = vpop.f32.mrf.mxu0  ;;  %v3279_v47 = vsub.f32 %v859_v2, %v3247_v21  ;;  %v3315_v50 = vand.u32 4294901760, %v856_v32  ;;  %v3350_v2 = vsub.f32 %v934_v3, %v3298_v48 }
  0xfe   :  { %v860_v4 = vmax.f32 %v835_v61, 0.0  ;;  %v853_v45 = vadd.f32 %v2640_v57, %v739_v62  ;;  %v733_v5 = vadd.f32 %v732_v1, %v615_v58  ;;  %v3235_v0 = vand.u32 4294901760, %v861_v59  ;;  %v871_v58 = vld [vmem:[%s3732_s3 + $0x38] sm:$0xff] }
  0xff   :  { %v3301_v26 = vsub.f32 %v858_v14, %v3263_v30  ;;  %v3329_v56 = vand.u32 4294901760, %v3279_v47  ;;  %v1031_v61 = vsub.f32 %v3258_v31, %v1030_v49  ;;  %v1040_v62 = vand.u32 4294901760, %v3296_v37 }
 0x100   :  { %v3240_v15 = vand.u32 4294901760, %v860_v4  ;;  %v863_v18 = vmax.f32 %v853_v45, 0.0  ;;  %v847_v19 = vadd.f32 %v846_v9, %v733_v5  ;;  %v3250_v22 = vsub.f32 %v861_v59, %v3235_v0 }
 0x101   :  { %v3347_v1 = vand.u32 4294901760, %v3301_v26  ;;  %v1050_v45 = vand.u32 4294901760, %v3319_v54  ;;  %v943_v5 = vsel %vm920_vm1, %v871_v58, 0  ;;  %v1146_v8 = vsub.f32 %v3279_v47, %v3329_v56 }
 0x102   :  { %v3252_v27 = vand.u32 4294901760, %v863_v18  ;;  %v862_v28 = vmax.f32 %v847_v19, 0.0  ;;  %v3266_v35 = vsub.f32 %v860_v4, %v3240_v15  ;;  %v3289_v43 = vand.u32 4294901760, %v3250_v22 }
 0x103   :  { %v3353_v4 = vsub.f32 %v856_v32, %v3315_v50  ;;  %v3362_v9 = vsub.f32 %v937_v46, %v3321_v44  ;;  %v1032_v14 = vand.u32 4294901760, %v1031_v61  ;;  %v3371_v19 = vand.u32 4294901760, %v3335_v60 }
 0x104   :  { %v3269_v36 = vsub.f32 %v863_v18, %v3252_v27  ;;  %v3271_v25 = vand.u32 4294901760, %v862_v28  ;;  %2641 = vmatprep.subr.mxu0 %v3252_v27  ;;  %v3310_v52 = vand.u32 4294901760, %v3266_v35  ;;  %v1132_v57 = vsub.f32 %v3250_v22, %v3289_v43 }
 0x105   :  { %2642 = vmatpush3.msra.mxu0 %v3252_v27  ;;  %v1041_v18 = vsub.f32 %v3296_v37, %v1040_v62  ;;  %v1153_v11 = vsub.f32 %v3301_v26, %v3347_v1  ;;  %v1060_v7 = vand.u32 4294901760, %v3350_v2  ;;  %v1051_v29 = vsub.f32 %v3319_v54, %v1050_v45 }
 0x106   :  { %v3282_v34 = vsub.f32 %v862_v28, %v3271_v25  ;;  %2643 = vmatprep.subr.mxu0 %v3271_v25  ;;  %v3286_v39 = vand.u32 4294901760, %v3269_v36  ;;  %v1139_v59 = vsub.f32 %v3266_v35, %v3310_v52  ;;  %v1133_v6 = vand.u32 4294901760, %v1132_v57 }
 0x107   :  { %2644 = vmatpush3.msra.mxu0 %v3271_v25  ;;  %v3377_v28 = vand.u32 4294901760, %v943_v5  ;;  %v3384_v23 = vand.u32 4294901760, %v3353_v4  ;;  %v1147_v3 = vand.u32 4294901760, %v1146_v8  ;;  %v1070_v32 = vand.u32 4294901760, %v3362_v9 }
 0x108   :  { %2645 = vmatprep.subr.mxu0 %v3235_v0  ;;  %v1118_v41 = vsub.f32 %v3269_v36, %v3286_v39  ;;  %v3307_v51 = vand.u32 4294901760, %v3282_v34  ;;  %v1140_v10 = vand.u32 4294901760, %v1139_v59  ;;  %v3389_v46 = vsub.f32 %v940_v42, %v3364_v13 }
 0x109   :  { %2646 = vmatpush3.msra.mxu0 %v3235_v0  ;;  %v1160_v40 = vsub.f32 %v3335_v60, %v3371_v19  ;;  %v3398_v57 = vsub.f32 %v943_v5, %v3377_v28  ;;  %v1052_v58 = vand.u32 4294901760, %v1051_v29  ;;  %v1167_v61 = vsub.f32 %v3353_v4, %v3384_v23 }
 0x10a   :  { %2647 = vmatprep.subr.mxu0 %v3240_v15  ;;  %v1119_v53 = vand.u32 4294901760, %v1118_v41  ;;  %v1125_v55 = vsub.f32 %v3282_v34, %v3307_v51  ;;  %v1042_v41 = vand.u32 4294901760, %v1041_v18  ;;  %v1071_v42 = vsub.f32 %v3362_v9, %v1070_v32 }
 0x10b   :  { %2648 = vmatpush3.msra.mxu0 %v3240_v15  ;;  %v1161_v59 = vand.u32 4294901760, %v1160_v40 }
 0x10c   :  { %2649 = vmatprep.subr.mxu0 %v3247_v21  ;;  %2669 = vmatprep.subr.mxu1 %v1119_v53  ;;  %v1126_v63 = vand.u32 4294901760, %v1125_v55  ;;  %v1061_v55 = vsub.f32 %v3350_v2, %v1060_v7  ;;  %v1072_v8 = vand.u32 4294901760, %v1071_v42 }
 0x10d   :  { %2650 = vmatpush3.msra.mxu0 %v3247_v21  ;;  %2670 = vmatpush3.msra.mxu1 %v1119_v53  ;;  %v1154_v53 = vand.u32 4294901760, %v1153_v11 }
 0x10e   :  { %2651 = vmatprep.subr.mxu0 %v3263_v30  ;;  %2671 = vmatprep.subr.mxu1 %v1126_v63  ;;  %v1062_v5 = vand.u32 4294901760, %v1061_v55 }
 0x10f   :  { %2652 = vmatpush3.msra.mxu0 %v3263_v30  ;;  %2672 = vmatpush3.msra.mxu1 %v1126_v63  ;;  %v1080_v63 = vand.u32 4294901760, %v3389_v46 }
 0x110   :  { %2653 = vmatprep.subr.mxu0 %v3291_v24  ;;  %2673 = vmatprep.subr.mxu1 %v1133_v6 }
 0x111   :  { %2654 = vmatpush3.msra.mxu0 %v3291_v24  ;;  %2674 = vmatpush3.msra.mxu1 %v1133_v6  ;;  %v1090_v6 = vand.u32 4294901760, %v3398_v57 }
 0x112   :  { %2655 = vmatprep.subr.mxu0 %v3315_v50  ;;  %2675 = vmatprep.subr.mxu1 %v1140_v10 }
 0x113   :  { %2656 = vmatpush3.msra.mxu0 %v3315_v50  ;;  %2676 = vmatpush3.msra.mxu1 %v1140_v10 }
 0x114   :  { %2658 = vmatmul.mubr.f32.vlgmr.msra.gmra.mxu0 %v1032_v14  ;;  %2677 = vmatprep.subr.mxu1 %v1147_v3  ;;  %v1081_v14 = vsub.f32 %v3389_v46, %v1080_v63 }
 0x115   :  { %2697 = vmatprep.subr.mxu0 %v3269_v36  ;;  %2678 = vmatpush3.msra.mxu1 %v1147_v3 }
 0x116   :  { %2698 = vmatpush3.msra.mxu0 %v3269_v36  ;;  %2679 = vmatprep.subr.mxu1 %v1154_v53  ;;  %v1168_v36 = vand.u32 4294901760, %v1167_v61  ;;  %v1082_v18 = vand.u32 4294901760, %v1081_v14 }
 0x117   :  { %2699 = vmatprep.subr.mxu0 %v3282_v34  ;;  %2660 = vmatprep.mubr.f32.mxu0 %v1042_v41 }
 0x118   :  { %2680 = vmatpush3.msra.mxu1 %v1154_v53  ;;  %2700 = vmatpush3.msra.mxu0 %v3282_v34  ;;  %v1091_v34 = vsub.f32 %v3398_v57, %v1090_v6 }
 0x119   :  { %2661 = vmatmul.mubr.f32.gmra.mxu0 %v1052_v58  ;;  %2681 = vmatprep.subr.mxu1 %v1161_v59 }
 0x11a   :  { %2701 = vmatprep.subr.mxu0 %v3250_v22  ;;  %2682 = vmatpush3.msra.mxu1 %v1161_v59 }
 0x11b   :  { %2702 = vmatpush3.msra.mxu0 %v3250_v22  ;;  %2683 = vmatprep.subr.mxu1 %v1168_v36  ;;  %v1092_v22 = vand.u32 4294901760, %v1091_v34 }
 0x11c   :  { %2703 = vmatprep.subr.mxu0 %v3266_v35  ;;  %2663 = vmatprep.mubr.f32.mxu0 %v1062_v5 }
 0x11d   :  { %2684 = vmatpush3.msra.mxu1 %v1168_v36  ;;  %2704 = vmatpush3.msra.mxu0 %v3266_v35 }
 0x11e   :  { %2664 = vmatmul.mubr.f32.gmra.mxu0 %v1072_v8  ;;  %2686 = vmatmul.mubr.f32.vlgmr.msra.gmra.mxu1 %v3237_v12 }
 0x11f   :  { %2705 = vmatprep.subr.mxu0 %v3279_v47  ;;  %2725 = vmatprep.subr.mxu1 %v3252_v27 }
 0x120   :  { %2706 = vmatpush3.msra.mxu0 %v3279_v47  ;;  %2726 = vmatpush3.msra.mxu1 %v3252_v27 }
 0x121   :  { %2707 = vmatprep.subr.mxu0 %v3301_v26  ;;  %2727 = vmatprep.subr.mxu1 %v3271_v25 }
 0x122   :  { %2666 = vmatprep.mubr.f32.mxu0 %v1082_v18  ;;  %2688 = vmatprep.mubr.f32.mxu1 %v3260_v33 }
 0x123   :  { %2708 = vmatpush3.msra.mxu0 %v3301_v26  ;;  %2728 = vmatpush3.msra.mxu1 %v3271_v25 }
 0x124   :  { %2667 = vmatmul.mubr.f32.gmra.mxu0 %v1092_v22  ;;  %2689 = vmatmul.mubr.f32.gmra.mxu1 %v3275_v38 }
 0x125   :  { %2709 = vmatprep.subr.mxu0 %v3335_v60  ;;  %2729 = vmatprep.subr.mxu1 %v3235_v0 }
 0x126   :  { %2710 = vmatpush3.msra.mxu0 %v3335_v60  ;;  %2730 = vmatpush3.msra.mxu1 %v3235_v0 }
 0x127   :  { %2711 = vmatprep.subr.mxu0 %v3353_v4  ;;  %2731 = vmatprep.subr.mxu1 %v3240_v15 }
 0x128   :  { %2691 = vmatprep.mubr.f32.mxu1 %v3298_v48  ;;  %2712 = vmatpush3.msra.mxu0 %v3353_v4 }
 0x129   :  { %2713 = vmatprep.mubr.f32.mxu0 %v3213_v17  ;;  %2732 = vmatpush3.msra.mxu1 %v3240_v15 }
 0x12a   :  { %2692 = vmatmul.mubr.f32.gmra.mxu1 %v3321_v44  ;;  %2714 = vmatmul.mubr.f32.vlgmr.msra.gmra.mxu0 %v3258_v31 }
 0x12b   :  { %2733 = vmatprep.subr.mxu1 %v3247_v21  ;;  %2753 = vmatprep.subr.mxu0 %v3286_v39 }
 0x12c   :  { %2734 = vmatpush3.msra.mxu1 %v3247_v21  ;;  %2754 = vmatpush3.msra.mxu0 %v3286_v39 }
 0x12d   :  { %2735 = vmatprep.subr.mxu1 %v3263_v30  ;;  %2755 = vmatprep.subr.mxu0 %v3307_v51 }
 0x12e   :  { %2694 = vmatprep.mubr.f32.mxu1 %v3364_v13  ;;  %2716 = vmatprep.mubr.f32.mxu0 %v3296_v37 }
 0x12f   :  { %2736 = vmatpush3.msra.mxu1 %v3263_v30  ;;  %2756 = vmatpush3.msra.mxu0 %v3307_v51 }
 0x130   :  { %2695 = vmatmul.mubr.f32.gmra.mxu1 %v3377_v28  ;;  %2717 = vmatmul.mubr.f32.gmra.mxu0 %v3319_v54  ;;  %v918_v54 = vpop.permute.xlu0 %917 }
 0x131   :  { %2737 = vmatprep.subr.mxu1 %v3291_v24  ;;  %2757 = vmatprep.subr.mxu0 %v3289_v43 }
 0x132   :  { %2738 = vmatpush3.msra.mxu1 %v3291_v24  ;;  %2758 = vmatpush3.msra.mxu0 %v3289_v43 }
 0x133   :  { %2739 = vmatprep.subr.mxu1 %v3315_v50  ;;  %2759 = vmatprep.subr.mxu0 %v3310_v52 }
 0x134   :  { %2719 = vmatprep.mubr.f32.mxu0 %v3350_v2  ;;  %2740 = vmatpush3.msra.mxu1 %v3315_v50  ;;  %v908_v2 = vpop.permute.xlu0 %907 }
 0x135   :  { %2741 = vmatprep.mubr.f32.mxu1 %v1020_v20  ;;  %2760 = vmatpush3.msra.mxu0 %v3310_v52 }
 0x136   :  { %2720 = vmatmul.mubr.f32.gmra.mxu0 %v3362_v9  ;;  %2742 = vmatmul.mubr.f32.vlgmr.msra.gmra.mxu1 %v1030_v49 }
 0x137   :  { %2761 = vmatprep.subr.mxu0 %v3329_v56  ;;  %2781 = vmatprep.subr.mxu1 %v3252_v27 }
 0x138   :  { %2762 = vmatpush3.msra.mxu0 %v3329_v56  ;;  %2782 = vmatpush3.msra.mxu1 %v3252_v27  ;;  %v898_v10 = vpop.permute.xlu0 %897 }
 0x139   :  { %2763 = vmatprep.subr.mxu0 %v3347_v1  ;;  %2783 = vmatprep.subr.mxu1 %v3271_v25 }
 0x13a   :  { %2722 = vmatprep.mubr.f32.mxu0 %v3389_v46  ;;  %2744 = vmatprep.mubr.f32.mxu1 %v1040_v62 }
 0x13b   :  { %2764 = vmatpush3.msra.mxu0 %v3347_v1  ;;  %2784 = vmatpush3.msra.mxu1 %v3271_v25 }
 0x13c   :  { %2723 = vmatmul.mubr.f32.gmra.mxu0 %v3398_v57  ;;  %2745 = vmatmul.mubr.f32.gmra.mxu1 %v1050_v45  ;;  %v888_v40 = vpop.permute.xlu0 %887 }
 0x13d   :  { %2765 = vmatprep.subr.mxu0 %v3371_v19  ;;  %2785 = vmatprep.subr.mxu1 %v3235_v0 }
 0x13e   :  { %2766 = vmatpush3.msra.mxu0 %v3371_v19  ;;  %2786 = vmatpush3.msra.mxu1 %v3235_v0 }
 0x13f   :  { %2767 = vmatprep.subr.mxu0 %v3384_v23  ;;  %2787 = vmatprep.subr.mxu1 %v3240_v15 }
 0x140   :  { %2747 = vmatprep.mubr.f32.mxu1 %v1060_v7  ;;  %2768 = vmatpush3.msra.mxu0 %v3384_v23 }
 0x141   :  { %2769 = vmatprep.mubr.f32.mxu0 %v3210_v16  ;;  %2788 = vmatpush3.msra.mxu1 %v3240_v15 }
 0x142   :  { %2748 = vmatmul.mubr.f32.gmra.mxu1 %v1070_v32  ;;  %2770 = vmatmul.mubr.f32.vlgmr.msra.gmra.mxu0 %v3237_v12 }
 0x143   :  { %2789 = vmatprep.subr.mxu1 %v3247_v21  ;;  %2750 = vmatprep.mubr.f32.mxu1 %v1080_v63 }
 0x144   :  { %2790 = vmatpush3.msra.mxu1 %v3247_v21  ;;  %2772 = vmatprep.mubr.f32.mxu0 %v3260_v33 }
 0x145   :  { %2791 = vmatprep.subr.mxu1 %v3263_v30 }
 0x146   :  { %2792 = vmatpush3.msra.mxu1 %v3263_v30  ;;  %2773 = vmatmul.mubr.f32.gmra.mxu0 %v3275_v38 }
 0x147   :  { %2751 = vmatmul.mubr.f32.gmra.mxu1 %v1090_v6  ;;  %2793 = vmatprep.subr.mxu1 %v3291_v24 }
 0x148   :  { %2794 = vmatpush3.msra.mxu1 %v3291_v24  ;;  %2775 = vmatprep.mubr.f32.mxu0 %v3298_v48 }
 0x149   :  { %2795 = vmatprep.subr.mxu1 %v3315_v50  ;;  %2797 = vmatprep.mubr.f32.mxu1 %v3210_v16  ;;  %v2952_v16 = vmov 0.0  }
 0x14a   :  { %2796 = vmatpush3.msra.mxu1 %v3315_v50  ;;  %2776 = vmatmul.mubr.f32.gmra.mxu0 %v3321_v44 }
 0x14b   :  { %2798 = vmatmul.mubr.f32.vlgmr.msra.gmra.mxu1 %v3237_v12  ;;  %2778 = vmatprep.mubr.f32.mxu0 %v3364_v13 }
 0x14c   :  { %2800 = vmatprep.mubr.f32.mxu1 %v3260_v33  ;;  %2809 = vmatprep.subr.mxu0 %v2952_v16 }
 0x14d   :  { %2828 = vmatprep.subr.mxu1 %v2952_v16 }
 0x14e   :  { %2779 = vmatmul.mubr.f32.gmra.mxu0 %v3377_v28 }
 0x14f   :  { %2801 = vmatmul.mubr.f32.gmra.mxu1 %v3275_v38  ;;  %2825 = vmatprep.mubr.msk.f32.mxu0 %vm2953_vm2, %v2952_v16 }
 0x150   :  { %2803 = vmatprep.mubr.f32.mxu1 %v3298_v48 }
 0x153   :  { %2804 = vmatmul.mubr.f32.gmra.mxu1 %v3321_v44  ;;  %v913_v44 = vpop.permute.xlu1 %912 }
 0x154   :  { %2806 = vmatprep.mubr.f32.mxu1 %v3364_v13 }
 0x157   :  { %2807 = vmatmul.mubr.f32.gmra.mxu1 %v3377_v28  ;;  %v903_v4 = vpop.permute.xlu1 %902 }
 0x158   :  { %2844 = vmatprep.mubr.msk.f32.mxu1 %vm2953_vm2, %v2952_v16 }
 0x15b   :  { %v893_v28 = vpop.permute.xlu1 %892 }
 0x15f   :  { %v883_v59 = vpop.permute.xlu1 %882 }
 0x1d4   :  { %v2659_v17 = vpop.f32.mrf.mxu0 }
 0x1d5   :  { %v1035_v57 = vadd.f32 %v2659_v17, %v888_v40 }
 0x1d6   :  { %v1024_v20 = vpop.f32.mrf.mxu0 }
 0x1d7   :  { %v1025_v8 = vadd.f32 %v1024_v20, %v883_v59 }
 0x1d9   :  { %v2662_v0 = vpop.f32.mrf.mxu0 }
 0x1da   :  { %v1055_v3 = vadd.f32 %v2662_v0, %v898_v10 }
 0x1db   :  { %v1044_v12 = vpop.f32.mrf.mxu0 }
 0x1dc   :  { %v1045_v53 = vadd.f32 %v1044_v12, %v893_v28 }
 0x1de   :  { %v2665_v15 = vpop.f32.mrf.mxu0  ;;  %v2687_v21 = vpop.f32.mrf.mxu1 }
 0x1df   :  { %v1075_v46 = vadd.f32 %v2665_v15, %v908_v2  ;;  %v1212_v14 = vadd.f32 %v2687_v21, %v1035_v57 }
 0x1e0   :  { %v1064_v27 = vpop.f32.mrf.mxu0  ;;  %v1205_v31 = vpop.f32.mrf.mxu1 }
 0x1e1   :  { %v1065_v58 = vadd.f32 %v1064_v27, %v903_v4  ;;  %v1206_v12 = vadd.f32 %v1205_v31, %v1025_v8 }
 0x1e4   :  { %v2668_v33 = vpop.f32.mrf.mxu0  ;;  %v2690_v30 = vpop.f32.mrf.mxu1 }
 0x1e5   :  { %v1224_v55 = vadd.f32 %v2690_v30, %v1055_v3  ;;  %v1095_v5 = vadd.f32 %v2668_v33, %v918_v54 }
 0x1e6   :  { %v1084_v35 = vpop.f32.mrf.mxu0  ;;  %v1217_v25 = vpop.f32.mrf.mxu1 }
 0x1e7   :  { %v1218_v6 = vadd.f32 %v1217_v25, %v1045_v53  ;;  %v1085_v0 = vadd.f32 %v1084_v35, %v913_v44  ;;  %v1791_v35 = vld [vmem:[%s3734_s5] sm:$0xff]  ;;  %s2954_s5 = smov [#allocation2]  }
 0x1e8   :  { %s2345_s15 = sshll.u32 %s2954_s5, 4  ;;  %s2346_s15 = int_to_ptr.vmem [resolvable:$true] %s2345_s15 }
 0x1e9   :  { %s2929_s16 = scalar_lea.vmem %s2346_s15, 128  ;;  %p2934_p1 = scmp.lt.s32.totalorder %s2346_s15, %s2346_s15 }
 0x1ea   :  { %v2693_v38 = vpop.f32.mrf.mxu1  ;;  %v2715_v47 = vpop.f32.mrf.mxu0  ;;  %p2930_p0 = scmp.ne.s32.totalorder %s2346_s15, %s2929_s16  ;;  %p2935_p2 = scmp.lt.s32.totalorder %s2929_s16, %s2929_s16 }
 0x1eb   :  { %v1236_v61 = vadd.f32 %v2693_v38, %v1075_v46  ;;  %v1343_v30 = vadd.f32 %v2715_v47, %v1212_v14 }
 0x1ec   :  { %v1229_v39 = vpop.f32.mrf.mxu1  ;;  %v1335_v43 = vpop.f32.mrf.mxu0  ;;  %p2936_p3 = por %p2935_p2, %p2934_p1 }
 0x1ed   :  { %v1230_v34 = vadd.f32 %v1229_v39, %v1065_v58 }
 0x1ee   :  { %p2937_p4 = pnand %p2936_p3, %p2930_p0 }
 0x1f0   :  { %v2696_v24 = vpop.f32.mrf.mxu1  ;;  %v2718_v49 = vpop.f32.mrf.mxu0 }
 0x1f1   :  { %v1357_v36 = vadd.f32 %v2718_v49, %v1224_v55  ;;  %v1248_v15 = vadd.f32 %v2696_v24, %v1095_v5  ;;  %v1336_v49 = vadd.f32 %v1335_v43, %v1206_v12 }
 0x1f2   :  { %v1241_v37 = vpop.f32.mrf.mxu1  ;;  %v1349_v48 = vpop.f32.mrf.mxu0 }
 0x1f3   :  { %v1350_v2 = vadd.f32 %v1349_v48, %v1218_v6  ;;  %v1242_v28 = vadd.f32 %v1241_v37, %v1085_v0 }
 0x1f6   :  { %v2721_v26 = vpop.f32.mrf.mxu0  ;;  %v2743_v51 = vpop.f32.mrf.mxu1 }
 0x1f7   :  { %v1371_v18 = vadd.f32 %v2721_v26, %v1236_v61  ;;  %v1474_v20 = vadd.f32 %v2743_v51, %v1343_v30 }
 0x1f8   :  { %v1363_v52 = vpop.f32.mrf.mxu0  ;;  %v3530_v50 = vpop.f32.mrf.mxu1 }
 0x1f9   :  { %v1364_v17 = vadd.f32 %v1363_v52, %v1230_v34  ;;  %v1466_v52 = vadd.f32 %v3530_v50, %v1336_v49 }
 0x1fc   :  { %v2724_v56 = vpop.f32.mrf.mxu0  ;;  %v2746_v60 = vpop.f32.mrf.mxu1 }
 0x1fd   :  { %v1490_v10 = vadd.f32 %v2746_v60, %v1357_v36  ;;  %v1385_v3 = vadd.f32 %v2724_v56, %v1248_v15 }
 0x1fe   :  { %v1377_v62 = vpop.f32.mrf.mxu0  ;;  %v1481_v1 = vpop.f32.mrf.mxu1 }
 0x1ff   :  { %v1482_v33 = vadd.f32 %v1481_v1, %v1350_v2  ;;  %v1378_v24 = vadd.f32 %v1377_v62, %v1242_v28 }
 0x202   :  { %v2749_v45 = vpop.f32.mrf.mxu1  ;;  %v2771_v9 = vpop.f32.mrf.mxu0 }
 0x203   :  { %v1506_v27 = vadd.f32 %v2749_v45, %v1371_v18  ;;  %v1623_v54 = vadd.f32 %v2771_v9, %v1474_v20  ;;  %v1799_v45 = vsel %vm920_vm1, %v1791_v35, 0 }
 0x204   :  { %v1497_v13 = vpop.f32.mrf.mxu1  ;;  %v1616_v19 = vpop.f32.mrf.mxu0  ;;  %v3539_v57 = vand.u32 4294901760, %v1799_v45 }
 0x205   :  { %v1498_v21 = vadd.f32 %v1497_v13, %v1364_v17  ;;  %v1617_v13 = vadd.f32 %v1616_v19, %v1466_v52 }
 0x206   :  { %v2774_v11 = vpop.f32.mrf.mxu0  ;;  %v3551_v36 = vsub.f32 %v1799_v45, %v3539_v57 }
 0x207   :  { %v2752_v7 = vpop.f32.mrf.mxu1  ;;  %v1635_v25 = vadd.f32 %v2774_v11, %v1490_v10 }
 0x208   :  { %v1628_v29 = vpop.f32.mrf.mxu0  ;;  %v1522_v31 = vadd.f32 %v2752_v7, %v1385_v3  ;;  %v1876_v30 = vand.u32 4294901760, %v3551_v36 }
 0x209   :  { %v1513_v23 = vpop.f32.mrf.mxu1  ;;  %v1629_v47 = vadd.f32 %v1628_v29, %v1482_v33 }
 0x20a   :  { %v2777_v32 = vpop.f32.mrf.mxu0  ;;  %v1514_v43 = vadd.f32 %v1513_v23, %v1378_v24  ;;  %v1877_v20 = vsub.f32 %v3551_v36, %v1876_v30 }
 0x20b   :  { %v2799_v41 = vpop.f32.mrf.mxu1  ;;  %v1647_v39 = vadd.f32 %v2777_v32, %v1506_v27 }
 0x20c   :  { %v1640_v42 = vpop.f32.mrf.mxu0  ;;  %v1744_v11 = vadd.f32 %v2799_v41, %v1623_v54 }
 0x20d   :  { %v1737_v63 = vpop.f32.mrf.mxu1  ;;  %v1641_v37 = vadd.f32 %v1640_v42, %v1498_v21 }
 0x20e   :  { %v2780_v38 = vpop.f32.mrf.mxu0  ;;  %v1738_v53 = vadd.f32 %v1737_v63, %v1617_v13  ;;  %v1784_v42 = vmax.f32 %v1744_v11, 0.0 }
 0x20f   :  { %v2802_v22 = vpop.f32.mrf.mxu1  ;;  %v1659_v51 = vadd.f32 %v2780_v38, %v1522_v31 }
 0x210   :  { %v1756_v48 = vadd.f32 %v2802_v22, %v1635_v25  ;;  %v1652_v44 = vpop.f32.mrf.mxu0  ;;  %v1783_v6 = vmax.f32 %v1738_v53, 0.0  ;;  %v3564_v22 = vand.u32 4294901760, %v1784_v42 }
 0x211   :  { %v1749_v4 = vpop.f32.mrf.mxu1  ;;  %v1653_v29 = vadd.f32 %v1652_v44, %v1514_v43 }
 0x212   :  { %v1750_v1 = vadd.f32 %v1749_v4, %v1629_v47  ;;  %v1786_v7 = vmax.f32 %v1756_v48, 0.0  ;;  %v3576_v12 = vand.u32 4294901760, %v1783_v6  ;;  %v3590_v28 = vsub.f32 %v1784_v42, %v3564_v22 }
 0x213   :  { %v2805_v26 = vpop.f32.mrf.mxu1  ;;  %v1878_v48 = vand.u32 4294901760, %v1877_v20 }
 0x214   :  { %v1768_v56 = vadd.f32 %v2805_v26, %v1647_v39  ;;  %v1785_v23 = vmax.f32 %v1750_v1, 0.0  ;;  %v3543_v19 = vand.u32 4294901760, %v1786_v7  ;;  %v3606_v21 = vsub.f32 %v1783_v6, %v3576_v12 }
 0x215   :  { %v1761_v60 = vpop.f32.mrf.mxu1  ;;  %v1945_v24 = vand.u32 4294901760, %v3590_v28 }
 0x216   :  { %v1788_v32 = vmax.f32 %v1768_v56, 0.0  ;;  %v1762_v46 = vadd.f32 %v1761_v60, %v1641_v37  ;;  %v3553_v8 = vand.u32 4294901760, %v1785_v23  ;;  %v3568_v0 = vsub.f32 %v1786_v7, %v3543_v19 }
 0x217   :  { %v2808_v62 = vpop.f32.mrf.mxu1  ;;  %v1952_v52 = vand.u32 4294901760, %v3606_v21  ;;  %v1946_v44 = vsub.f32 %v3590_v28, %v1945_v24 }
 0x218   :  { %v1780_v40 = vadd.f32 %v2808_v62, %v1659_v51  ;;  %v3537_v50 = vand.u32 4294901760, %v1788_v32  ;;  %v1787_v9 = vmax.f32 %v1762_v46, 0.0  ;;  %v3581_v17 = vsub.f32 %v1785_v23, %v3553_v8 }
 0x219   :  { %v1773_v55 = vpop.f32.mrf.mxu1  ;;  %v1931_v3 = vand.u32 4294901760, %v3568_v0  ;;  %v1953_v60 = vsub.f32 %v3606_v21, %v1952_v52  ;;  %v1947_v51 = vand.u32 4294901760, %v1946_v44 }
 0x21a   :  { %v1790_v58 = vmax.f32 %v1780_v40, 0.0  ;;  %v1774_v61 = vadd.f32 %v1773_v55, %v1653_v29  ;;  %v3541_v59 = vand.u32 4294901760, %v1787_v9  ;;  %v3546_v41 = vsub.f32 %v1788_v32, %v3537_v50  ;;  %v1796_v40 = vpop.permute.xlu0 %1795 }
 0x21b   :  { %v1938_v39 = vand.u32 4294901760, %v3581_v17  ;;  %v1932_v31 = vsub.f32 %v3568_v0, %v1931_v3  ;;  %v1954_v1 = vand.u32 4294901760, %v1953_v60 }
 0x21c   :  { %v3548_v5 = vand.u32 4294901760, %v1790_v58  ;;  %v1789_v63 = vmax.f32 %v1774_v61, 0.0  ;;  %v3556_v14 = vsub.f32 %v1787_v9, %v3541_v59  ;;  %v1917_v15 = vand.u32 4294901760, %v3546_v41 }
 0x21d   :  { %v1939_v54 = vsub.f32 %v3581_v17, %v1938_v39  ;;  %v1933_v56 = vand.u32 4294901760, %v1932_v31 }
 0x21e   :  { %v3559_v34 = vsub.f32 %v1790_v58, %v3548_v5  ;;  %v3561_v18 = vand.u32 4294901760, %v1789_v63  ;;  %2810 = vmatpush3.msra.mxu0 %v3548_v5  ;;  %v1924_v27 = vand.u32 4294901760, %v3556_v14  ;;  %v1918_v33 = vsub.f32 %v3546_v41, %v1917_v15 }
 0x21f   :  { %2811 = vmatprep.subr.mxu0 %v2952_v16  ;;  %v1940_v43 = vand.u32 4294901760, %v1939_v54 }
 0x220   :  { %v1903_v2 = vand.u32 4294901760, %v3559_v34  ;;  %v3573_v10 = vsub.f32 %v1789_v63, %v3561_v18  ;;  %2812 = vmatpush3.msra.mxu0 %v3561_v18  ;;  %v1925_v26 = vsub.f32 %v3556_v14, %v1924_v27  ;;  %v1919_v47 = vand.u32 4294901760, %v1918_v33 }
 0x221   :  { %2813 = vmatprep.subr.mxu0 %v2952_v16 }
 0x222   :  { %v1904_v38 = vsub.f32 %v3559_v34, %v1903_v2  ;;  %v1910_v4 = vand.u32 4294901760, %v3573_v10  ;;  %2814 = vmatpush3.msra.mxu0 %v3537_v50  ;;  %v1926_v37 = vand.u32 4294901760, %v1925_v26 }
 0x223   :  { %2815 = vmatprep.subr.mxu0 %v2952_v16 }
 0x224   :  { %v1911_v25 = vsub.f32 %v3573_v10, %v1910_v4  ;;  %2816 = vmatpush3.msra.mxu0 %v3541_v59  ;;  %v1905_v49 = vand.u32 4294901760, %v1904_v38 }
 0x225   :  { %2817 = vmatprep.subr.mxu0 %v2952_v16 }
 0x226   :  { %2818 = vmatpush3.msra.mxu0 %v3543_v19  ;;  %2829 = vmatpush3.msra.mxu1 %v1905_v49  ;;  %v1912_v35 = vand.u32 4294901760, %v1911_v25 }
 0x227   :  { %2819 = vmatprep.subr.mxu0 %v2952_v16  ;;  %2830 = vmatprep.subr.mxu1 %v2952_v16 }
 0x228   :  { %2820 = vmatpush3.msra.mxu0 %v3553_v8  ;;  %2831 = vmatpush3.msra.mxu1 %v1912_v35 }
 0x229   :  { %2821 = vmatprep.subr.mxu0 %v2952_v16  ;;  %2832 = vmatprep.subr.mxu1 %v2952_v16 }
 0x22a   :  { %2822 = vmatpush3.msra.mxu0 %v3564_v22  ;;  %2833 = vmatpush3.msra.mxu1 %v1919_v47 }
 0x22b   :  { %2823 = vmatprep.subr.mxu0 %v2952_v16  ;;  %2834 = vmatprep.subr.mxu1 %v2952_v16 }
 0x22c   :  { %2824 = vmatpush3.msra.mxu0 %v3576_v12  ;;  %2835 = vmatpush3.msra.mxu1 %v1926_v37 }
 0x22d   :  { %2826 = vmatmul.mubr.f32.vlgmr.msra.gmra.mxu0 %v1878_v48  ;;  %2836 = vmatprep.subr.mxu1 %v2952_v16 }
 0x22e   :  { %2847 = vmatprep.subr.mxu0 %v2952_v16  ;;  %2837 = vmatpush3.msra.mxu1 %v1933_v56 }
 0x22f   :  { %2848 = vmatpush3.msra.mxu0 %v3559_v34  ;;  %2838 = vmatprep.subr.mxu1 %v2952_v16 }
 0x230   :  { %2849 = vmatprep.subr.mxu0 %v2952_v16  ;;  %2839 = vmatpush3.msra.mxu1 %v1940_v43 }
 0x231   :  { %2850 = vmatpush3.msra.mxu0 %v3573_v10  ;;  %2840 = vmatprep.subr.mxu1 %v2952_v16 }
 0x232   :  { %2851 = vmatprep.subr.mxu0 %v2952_v16  ;;  %2841 = vmatpush3.msra.mxu1 %v1947_v51 }
 0x233   :  { %2852 = vmatpush3.msra.mxu0 %v3546_v41  ;;  %2842 = vmatprep.subr.mxu1 %v2952_v16 }
 0x234   :  { %2853 = vmatprep.subr.mxu0 %v2952_v16  ;;  %2843 = vmatpush3.msra.mxu1 %v1954_v1 }
 0x235   :  { %2854 = vmatpush3.msra.mxu0 %v3556_v14  ;;  %2845 = vmatmul.mubr.f32.vlgmr.msra.gmra.mxu1 %v3539_v57 }
 0x236   :  { %2855 = vmatprep.subr.mxu0 %v2952_v16  ;;  %2866 = vmatprep.subr.mxu1 %v2952_v16 }
 0x237   :  { %2856 = vmatpush3.msra.mxu0 %v3568_v0  ;;  %2867 = vmatpush3.msra.mxu1 %v3548_v5 }
 0x238   :  { %2857 = vmatprep.subr.mxu0 %v2952_v16  ;;  %2868 = vmatprep.subr.mxu1 %v2952_v16 }
 0x239   :  { %2858 = vmatpush3.msra.mxu0 %v3581_v17  ;;  %2869 = vmatpush3.msra.mxu1 %v3561_v18 }
 0x23a   :  { %2859 = vmatprep.subr.mxu0 %v2952_v16  ;;  %2870 = vmatprep.subr.mxu1 %v2952_v16 }
 0x23b   :  { %2860 = vmatpush3.msra.mxu0 %v3590_v28  ;;  %2871 = vmatpush3.msra.mxu1 %v3537_v50 }
 0x23c   :  { %2861 = vmatprep.subr.mxu0 %v2952_v16  ;;  %2872 = vmatprep.subr.mxu1 %v2952_v16 }
 0x23d   :  { %2862 = vmatpush3.msra.mxu0 %v3606_v21  ;;  %2863 = vmatprep.mubr.msk.f32.mxu0 %vm2953_vm2, %v2952_v16 }
 0x23e   :  { %2873 = vmatpush3.msra.mxu1 %v3541_v59  ;;  %2864 = vmatmul.mubr.f32.vlgmr.msra.gmra.mxu0 %v3551_v36 }
 0x23f   :  { %2874 = vmatprep.subr.mxu1 %v2952_v16  ;;  %2885 = vmatprep.subr.mxu0 %v2952_v16 }
 0x240   :  { %2875 = vmatpush3.msra.mxu1 %v3543_v19  ;;  %2886 = vmatpush3.msra.mxu0 %v1903_v2 }
 0x241   :  { %2876 = vmatprep.subr.mxu1 %v2952_v16  ;;  %2887 = vmatprep.subr.mxu0 %v2952_v16 }
 0x242   :  { %2877 = vmatpush3.msra.mxu1 %v3553_v8  ;;  %2888 = vmatpush3.msra.mxu0 %v1910_v4 }
 0x243   :  { %2878 = vmatprep.subr.mxu1 %v2952_v16  ;;  %2889 = vmatprep.subr.mxu0 %v2952_v16 }
 0x244   :  { %2879 = vmatpush3.msra.mxu1 %v3564_v22  ;;  %2890 = vmatpush3.msra.mxu0 %v1917_v15 }
 0x245   :  { %2880 = vmatprep.subr.mxu1 %v2952_v16  ;;  %2891 = vmatprep.subr.mxu0 %v2952_v16 }
 0x246   :  { %2881 = vmatpush3.msra.mxu1 %v3576_v12  ;;  %2882 = vmatprep.mubr.msk.f32.mxu1 %vm2953_vm2, %v2952_v16 }
 0x247   :  { %2892 = vmatpush3.msra.mxu0 %v1924_v27  ;;  %2883 = vmatmul.mubr.f32.vlgmr.msra.gmra.mxu1 %v1876_v30 }
 0x248   :  { %2893 = vmatprep.subr.mxu0 %v2952_v16  ;;  %2904 = vmatprep.subr.mxu1 %v2952_v16 }
 0x249   :  { %2894 = vmatpush3.msra.mxu0 %v1931_v3  ;;  %2905 = vmatpush3.msra.mxu1 %v3548_v5 }
 0x24a   :  { %2895 = vmatprep.subr.mxu0 %v2952_v16  ;;  %2906 = vmatprep.subr.mxu1 %v2952_v16 }
 0x24b   :  { %2896 = vmatpush3.msra.mxu0 %v1938_v39  ;;  %2907 = vmatpush3.msra.mxu1 %v3561_v18 }
 0x24c   :  { %2897 = vmatprep.subr.mxu0 %v2952_v16  ;;  %2908 = vmatprep.subr.mxu1 %v2952_v16 }
 0x24d   :  { %2898 = vmatpush3.msra.mxu0 %v1945_v24  ;;  %2909 = vmatpush3.msra.mxu1 %v3537_v50 }
 0x24e   :  { %2899 = vmatprep.subr.mxu0 %v2952_v16  ;;  %2910 = vmatprep.subr.mxu1 %v2952_v16 }
 0x24f   :  { %2900 = vmatpush3.msra.mxu0 %v1952_v52  ;;  %2901 = vmatprep.mubr.msk.f32.mxu0 %vm2953_vm2, %v2952_v16 }
 0x250   :  { %2911 = vmatpush3.msra.mxu1 %v3541_v59  ;;  %2902 = vmatmul.mubr.f32.vlgmr.msra.gmra.mxu0 %v3539_v57 }
 0x251   :  { %2912 = vmatprep.subr.mxu1 %v2952_v16  ;;  %2920 = vmatprep.mubr.msk.f32.mxu1 %vm2953_vm2, %v2952_v16 }
 0x252   :  { %2913 = vmatpush3.msra.mxu1 %v3543_v19 }
 0x253   :  { %2914 = vmatprep.subr.mxu1 %v2952_v16 }
 0x254   :  { %2915 = vmatpush3.msra.mxu1 %v3553_v8 }
 0x255   :  { %2916 = vmatprep.subr.mxu1 %v2952_v16 }
 0x256   :  { %2917 = vmatpush3.msra.mxu1 %v3564_v22 }
 0x257   :  { %2918 = vmatprep.subr.mxu1 %v2952_v16 }
 0x258   :  { %2919 = vmatpush3.msra.mxu1 %v3576_v12 }
 0x259   :  { %2921 = vmatmul.mubr.f32.vlgmr.msra.gmra.mxu1 %v3539_v57 }
 0x2ed   :  { %v1880_v45 = vpop.f32.mrf.mxu0 }
 0x2ee   :  { %v1881_v53 = vadd.f32 %v1880_v45, %v1796_v40 }
 0x2ef   :  { %v2827_v13 = vpop.f32.mrf.mxu0 }
 0x2f5   :  { %v1991_v11 = vpop.f32.mrf.mxu1 }
 0x2f6   :  { %v1992_v9 = vadd.f32 %v1991_v11, %v1881_v53 }
 0x2f7   :  { %v2846_v32 = vpop.f32.mrf.mxu1 }
 0x2fe   :  { %v2079_v46 = vpop.f32.mrf.mxu0 }
 0x2ff   :  { %v2080_v23 = vadd.f32 %v2079_v46, %v1992_v9 }
 0x300   :  { %v2865_v62 = vpop.f32.mrf.mxu0 }
 0x307   :  { %v2160_v7 = vpop.f32.mrf.mxu1 }
 0x308   :  { %v2161_v58 = vadd.f32 %v2160_v7, %v2080_v23 }
 0x309   :  { %v2884_v29 = vpop.f32.mrf.mxu1 }
 0x310   :  { %v2255_v50 = vpop.f32.mrf.mxu0 }
 0x311   :  { %v2256_v16 = vadd.f32 %v2255_v50, %v2161_v58 }
 0x312   :  { %v2903_v55 = vpop.f32.mrf.mxu0 }
 0x319   :  { %v2334_v61 = vpop.f32.mrf.mxu1 }
 0x31a   :  { %v2335_v57 = vadd.f32 %v2334_v61, %v2256_v16 }
 0x31b   :  { %v2922_v42 = vpop.f32.mrf.mxu1 }
 0x31c   :  { %2338 = vst [vmem:[#allocation2] sm:$0xff] %v2335_v57 }
 0x31d   :  { %2940 = shalt.err (!%p2937_p4)
}
 0x31e   :  { %2348 = dma.vmem_to_hbm [thread:$0]  %s2346_s15, 128, %s3736_s7, [#allocation3]  }
 0x31f   :  { %2949 = dma.done.wait [#allocation3], 128  }
 0x320   :  { %2950 = vsyncadd [#allocation3], 4294967168 }
 0x321   :  { %2352 = vsyncpa [#allocation3], 1 }

</bundles_post_ra>
